<compile_context>
chip_gen: v7x
topology: tpu7x:2x2x1
jax: 0.10.0
libtpu: 0.0.40
codegen_flags: <defaults>
</compile_context>

<pallas_src>
import functools

import jax
import jax.numpy as jnp
from jax.experimental import pallas as pl
from jax.experimental.pallas import tpu as pltpu

NEG_SLOPE = 0.01   # nn.LeakyReLU default
LN_EPS = 1e-5      # nn.LayerNorm default
LANE = 128


def _round_up(n, m):
    return ((n + m - 1) // m) * m


def _leaky_relu(x):
    return jnp.where(x >= 0, x, NEG_SLOPE * x)


def mlp_kernel(x_ref,
               w1_ref, b1_ref, g1_ref, be1_ref,
               w2_ref, b2_ref, g2_ref, be2_ref,
               wpi_ref, bpi_ref,
               logit_ref, lgsm_ref,
               *, h_valid, a_valid):
    """One batch-tile of the full MLP. All feature dims are 128-padded."""
    x = x_ref[...].astype(jnp.float32)
    h_pad = w1_ref.shape[1]
    a_pad = wpi_ref.shape[1]

    # Lane masks for the real (unpadded) feature / action columns.
    h_mask = jax.lax.broadcasted_iota(jnp.int32, (1, h_pad), 1) < h_valid
    a_mask = jax.lax.broadcasted_iota(jnp.int32, (1, a_pad), 1) < a_valid
    inv_h = jnp.float32(1.0 / h_valid)

    def layernorm(h, gamma, beta):
        # Padded lanes of h are exactly 0 (zero weight cols / zero bias), so a
        # full-lane sum equals the sum over the real 100 features; variance
        # uses a masked diff so padded lanes do not contribute (0 - mu)^2.
        mu = jnp.sum(h, axis=-1, keepdims=True) * inv_h
        diff = jnp.where(h_mask, h - mu, 0.0)
        var = jnp.sum(diff * diff, axis=-1, keepdims=True) * inv_h
        # gamma/beta are zero in padded lanes -> padded output stays 0.
        return diff * jax.lax.rsqrt(var + LN_EPS) * gamma + beta

    # layer 1: linear -> leaky_relu -> layernorm
    h = jnp.dot(x, w1_ref[...], preferred_element_type=jnp.float32) + b1_ref[...]
    h = _leaky_relu(h)
    h = layernorm(h, g1_ref[...], be1_ref[...])

    # layer 2: linear -> leaky_relu -> layernorm
    h = jnp.dot(h, w2_ref[...], preferred_element_type=jnp.float32) + b2_ref[...]
    h = _leaky_relu(h)
    h = layernorm(h, g2_ref[...], be2_ref[...])

    # pi head + log_softmax(dim=-1), masking padded action lanes.
    logits = jnp.dot(h, wpi_ref[...], preferred_element_type=jnp.float32) + bpi_ref[...]
    masked = jnp.where(a_mask, logits, -jnp.inf)
    m = jnp.max(masked, axis=-1, keepdims=True)
    p = jnp.where(a_mask, jnp.exp(masked - m), 0.0)
    lse = m + jnp.log(jnp.sum(p, axis=-1, keepdims=True))

    logit_ref[...] = logits
    lgsm_ref[...] = logits - lse


def network_forward(x, params, *, block_b=128):
    """x: [B, iDim] float32; params: dict of weights stored as (in, out)."""
    B, ip_dim = x.shape
    hidden = params["w1"].shape[1]
    num_action = params["wpi"].shape[1]

    ip_pad = _round_up(ip_dim, LANE)
    h_pad = _round_up(hidden, LANE)
    a_pad = _round_up(num_action, LANE)

    tb = min(block_b, _round_up(B, 8))       # batch tile (multiple of 8 sublanes)
    b_pad = _round_up(B, tb)

    f32 = jnp.float32

    def pad2(a, rows, cols):
        return jnp.zeros((rows, cols), f32).at[:a.shape[0], :a.shape[1]].set(
            a.astype(f32))

    xp = pad2(x, b_pad, ip_pad)
    w1 = pad2(params["w1"], ip_pad, h_pad)
    b1 = pad2(params["b1"], 1, h_pad)
    g1 = pad2(params["g1"], 1, h_pad)
    be1 = pad2(params["be1"], 1, h_pad)
    w2 = pad2(params["w2"], h_pad, h_pad)
    b2 = pad2(params["b2"], 1, h_pad)
    g2 = pad2(params["g2"], 1, h_pad)
    be2 = pad2(params["be2"], 1, h_pad)
    wpi = pad2(params["wpi"], h_pad, a_pad)
    bpi = pad2(params["bpi"], 1, a_pad)

    vmem = pltpu.MemorySpace.VMEM

    def row_spec(cols):  # batch-tiled activations / outputs
        return pl.BlockSpec((tb, cols), lambda i: (i, 0), memory_space=vmem)

    def const_spec(shape):  # weights / biases: VMEM-resident, constant index
        return pl.BlockSpec(shape, lambda i: (0, 0), memory_space=vmem)

    kernel = functools.partial(mlp_kernel, h_valid=hidden, a_valid=num_action)

    out_shapes = (
        jax.ShapeDtypeStruct((b_pad, a_pad), f32),  # pi_logit (padded)
        jax.ShapeDtypeStruct((b_pad, a_pad), f32),  # log_softmax (padded)
    )

    logits_p, lgsm_p = pl.pallas_call(
        kernel,
        out_shape=out_shapes,
        grid_spec=pltpu.PrefetchScalarGridSpec(
            num_scalar_prefetch=0,
            grid=(b_pad // tb,),
            in_specs=[
                row_spec(ip_pad),
                const_spec((ip_pad, h_pad)), const_spec((1, h_pad)),
                const_spec((1, h_pad)), const_spec((1, h_pad)),
                const_spec((h_pad, h_pad)), const_spec((1, h_pad)),
                const_spec((1, h_pad)), const_spec((1, h_pad)),
                const_spec((h_pad, a_pad)), const_spec((1, a_pad)),
            ],
            out_specs=[row_spec(a_pad), row_spec(a_pad)],
        ),
        compiler_params=pltpu.CompilerParams(
            dimension_semantics=("parallel",),   # shard batch across v7x TCs
        ),
    )(xp, w1, b1, g1, be1, w2, b2, g2, be2, wpi, bpi)

    return logits_p[:B, :num_action], lgsm_p[:B, :num_action]


def init_params(key, ip_dim, num_action, hidden=100):
    """Deterministic synthetic init. Weights stored as (in, out)."""
    ks = jax.random.split(key, 6)
    s1 = 1.0 / jnp.sqrt(ip_dim)
    s2 = 1.0 / jnp.sqrt(hidden)
    return {
        "w1": jax.random.uniform(ks[0], (ip_dim, hidden), jnp.float32, -s1, s1),
        "b1": jax.random.uniform(ks[1], (1, hidden), jnp.float32, -s1, s1),
        "g1": jnp.ones((1, hidden), jnp.float32),
        "be1": jnp.zeros((1, hidden), jnp.float32),
        "w2": jax.random.uniform(ks[2], (hidden, hidden), jnp.float32, -s2, s2),
        "b2": jax.random.uniform(ks[3], (1, hidden), jnp.float32, -s2, s2),
        "g2": jnp.ones((1, hidden), jnp.float32),
        "be2": jnp.zeros((1, hidden), jnp.float32),
        "wpi": jax.random.uniform(ks[4], (hidden, num_action), jnp.float32, -s2, s2),
        "bpi": jax.random.uniform(ks[5], (1, num_action), jnp.float32, -s2, s2),
    }


def _reference_forward(x, p):
    """Pure-JAX reference (unpadded) for a sanity check."""
    def ln(h, g, b):
        mu = jnp.mean(h, axis=-1, keepdims=True)
        var = jnp.mean((h - mu) * (h - mu), axis=-1, keepdims=True)
        return (h - mu) * jax.lax.rsqrt(var + LN_EPS) * g + b

    h = _leaky_relu(x @ p["w1"] + p["b1"])
    h = ln(h, p["g1"], p["be1"])
    h = _leaky_relu(h @ p["w2"] + p["b2"])
    h = ln(h, p["g2"], p["be2"])
    logits = h @ p["wpi"] + p["bpi"]
    return logits, jax.nn.log_softmax(logits, axis=-1)


if __name__ == "__main__":
    key = jax.random.PRNGKey(0)
    kx, kp = jax.random.split(key)

    B, IP_DIM, NUM_ACTION = 8, 32, 8
    x = jax.random.normal(kx, (B, IP_DIM), jnp.float32)
    params = init_params(kp, IP_DIM, NUM_ACTION)

    pi_logit, lg_sm = network_forward(x, params)
    jax.block_until_ready((pi_logit, lg_sm))

    # sanity check vs plain JAX
    ref_logit, ref_lgsm = _reference_forward(x, params)
    assert pi_logit.shape == (B, NUM_ACTION) and lg_sm.shape == (B, NUM_ACTION)
    assert jnp.allclose(pi_logit, ref_logit, atol=1e-4, rtol=1e-4)
    assert jnp.allclose(lg_sm, ref_lgsm, atol=1e-4, rtol=1e-4)

    print("KERNEL_OK")
</pallas_src>

<mosaic_0001>
module attributes {stable_mosaic.version = 11 : i64} {
  func.func @mlp_kernel(%arg0: i32, %arg1: memref<8x128xf32, #tpu.memory_space<vmem>>, %arg2: memref<128x128xf32, #tpu.memory_space<vmem>>, %arg3: memref<1x128xf32, #tpu.memory_space<vmem>>, %arg4: memref<1x128xf32, #tpu.memory_space<vmem>>, %arg5: memref<1x128xf32, #tpu.memory_space<vmem>>, %arg6: memref<128x128xf32, #tpu.memory_space<vmem>>, %arg7: memref<1x128xf32, #tpu.memory_space<vmem>>, %arg8: memref<1x128xf32, #tpu.memory_space<vmem>>, %arg9: memref<1x128xf32, #tpu.memory_space<vmem>>, %arg10: memref<128x128xf32, #tpu.memory_space<vmem>>, %arg11: memref<1x128xf32, #tpu.memory_space<vmem>>, %arg12: memref<8x128xf32, #tpu.memory_space<vmem>>, %arg13: memref<8x128xf32, #tpu.memory_space<vmem>>) attributes {dimension_semantics = [#tpu.dimension_semantics<parallel>], iteration_bounds = array<i64: 1>, scalar_prefetch = 0 : i64, scratch_operands = 0 : i64, tpu.core_type = #tpu.core_type<tc>, window_params = [{transform_indices = @transform_0, window_bounds = array<i64: 8, 128>}, {pipeline_mode = #tpu.pipeline_mode<synchronous>, transform_indices = @transform_1, window_bounds = array<i64: 128, 128>}, {pipeline_mode = #tpu.pipeline_mode<synchronous>, transform_indices = @transform_2, window_bounds = array<i64: 1, 128>}, {pipeline_mode = #tpu.pipeline_mode<synchronous>, transform_indices = @transform_3, window_bounds = array<i64: 1, 128>}, {pipeline_mode = #tpu.pipeline_mode<synchronous>, transform_indices = @transform_4, window_bounds = array<i64: 1, 128>}, {pipeline_mode = #tpu.pipeline_mode<synchronous>, transform_indices = @transform_5, window_bounds = array<i64: 128, 128>}, {pipeline_mode = #tpu.pipeline_mode<synchronous>, transform_indices = @transform_6, window_bounds = array<i64: 1, 128>}, {pipeline_mode = #tpu.pipeline_mode<synchronous>, transform_indices = @transform_7, window_bounds = array<i64: 1, 128>}, {pipeline_mode = #tpu.pipeline_mode<synchronous>, transform_indices = @transform_8, window_bounds = array<i64: 1, 128>}, {pipeline_mode = #tpu.pipeline_mode<synchronous>, transform_indices = @transform_9, window_bounds = array<i64: 128, 128>}, {pipeline_mode = #tpu.pipeline_mode<synchronous>, transform_indices = @transform_10, window_bounds = array<i64: 1, 128>}, {transform_indices = @transform_11, window_bounds = array<i64: 8, 128>}, {transform_indices = @transform_12, window_bounds = array<i64: 8, 128>}]} {
    %c0 = arith.constant 0 : index
    %c0_0 = arith.constant 0 : index
    %0 = vector.load %arg1[%c0, %c0_0] : memref<8x128xf32, #tpu.memory_space<vmem>>, vector<8x128xf32>
    %1 = tpu.iota {dimensions = array<i32: 1>} : vector<1x128xi32>
    %c100_i32 = arith.constant 100 : i32
    %2 = vector.broadcast %c100_i32 : i32 to vector<1x128xi32>
    %3 = arith.cmpi slt, %1, %2 : vector<1x128xi32>
    %4 = tpu.iota {dimensions = array<i32: 1>} : vector<1x128xi32>
    %c8_i32 = arith.constant 8 : i32
    %5 = vector.broadcast %c8_i32 : i32 to vector<1x128xi32>
    %6 = arith.cmpi slt, %4, %5 : vector<1x128xi32>
    %c0_1 = arith.constant 0 : index
    %c0_2 = arith.constant 0 : index
    %7 = vector.load %arg2[%c0_1, %c0_2] : memref<128x128xf32, #tpu.memory_space<vmem>>, vector<128x128xf32>
    %cst = arith.constant dense<0.000000e+00> : vector<8x128xf32>
    %8 = tpu.matmul %0, %7, %cst {dimension_numbers = #tpu.dot_dimension_numbers<[1], [0], [0], [1], [0, 0, 1, 1], [], []>} : vector<8x128xf32>, vector<128x128xf32>, vector<8x128xf32> -> vector<8x128xf32>
    %c0_3 = arith.constant 0 : index
    %c0_4 = arith.constant 0 : index
    %9 = vector.load %arg3[%c0_3, %c0_4] : memref<1x128xf32, #tpu.memory_space<vmem>>, vector<1x128xf32>
    %10 = vector.broadcast %9 : vector<1x128xf32> to vector<8x128xf32>
    %11 = arith.addf %8, %10 : vector<8x128xf32>
    %cst_5 = arith.constant 0.000000e+00 : f32
    %12 = vector.broadcast %cst_5 : f32 to vector<8x128xf32>
    %13 = arith.cmpf oge, %11, %12 : vector<8x128xf32>
    %cst_6 = arith.constant 0.00999999977 : f32
    %14 = vector.broadcast %cst_6 : f32 to vector<8x128xf32>
    %15 = arith.mulf %14, %11 : vector<8x128xf32>
    %16 = arith.select %13, %11, %15 : vector<8x128xi1>, vector<8x128xf32>
    %c0_7 = arith.constant 0 : index
    %c0_8 = arith.constant 0 : index
    %17 = vector.load %arg4[%c0_7, %c0_8] : memref<1x128xf32, #tpu.memory_space<vmem>>, vector<1x128xf32>
    %c0_9 = arith.constant 0 : index
    %c0_10 = arith.constant 0 : index
    %18 = vector.load %arg5[%c0_9, %c0_10] : memref<1x128xf32, #tpu.memory_space<vmem>>, vector<1x128xf32>
    %cst_11 = arith.constant dense<0.000000e+00> : vector<8xf32>
    %19 = vector.multi_reduction <add>, %16, %cst_11 [1] : vector<8x128xf32> to vector<8xf32>
    %20 = vector.shape_cast %19 : vector<8xf32> to vector<8x1xf32>
    %cst_12 = arith.constant 0.00999999977 : f32
    %21 = vector.broadcast %cst_12 : f32 to vector<8x1xf32>
    %22 = arith.mulf %20, %21 : vector<8x1xf32>
    %23 = vector.broadcast %22 : vector<8x1xf32> to vector<8x128xf32>
    %24 = arith.subf %16, %23 : vector<8x128xf32>
    %cst_13 = arith.constant 0.000000e+00 : f32
    %25 = vector.shape_cast %3 : vector<1x128xi1> to vector<1x128xi1>
    %26 = vector.broadcast %25 : vector<1x128xi1> to vector<8x128xi1>
    %27 = vector.broadcast %cst_13 : f32 to vector<8x128xf32>
    %28 = arith.select %26, %24, %27 : vector<8x128xi1>, vector<8x128xf32>
    %29 = arith.mulf %28, %28 : vector<8x128xf32>
    %cst_14 = arith.constant dense<0.000000e+00> : vector<8xf32>
    %30 = vector.multi_reduction <add>, %29, %cst_14 [1] : vector<8x128xf32> to vector<8xf32>
    %31 = vector.shape_cast %30 : vector<8xf32> to vector<8x1xf32>
    %cst_15 = arith.constant 0.00999999977 : f32
    %32 = vector.broadcast %cst_15 : f32 to vector<8x1xf32>
    %33 = arith.mulf %31, %32 : vector<8x1xf32>
    %cst_16 = arith.constant 9.99999974E-6 : f32
    %34 = vector.broadcast %cst_16 : f32 to vector<8x1xf32>
    %35 = arith.addf %33, %34 : vector<8x1xf32>
    %36 = math.rsqrt %35 : vector<8x1xf32>
    %37 = vector.broadcast %36 : vector<8x1xf32> to vector<8x128xf32>
    %38 = arith.mulf %28, %37 : vector<8x128xf32>
    %39 = vector.broadcast %17 : vector<1x128xf32> to vector<8x128xf32>
    %40 = arith.mulf %38, %39 : vector<8x128xf32>
    %41 = vector.broadcast %18 : vector<1x128xf32> to vector<8x128xf32>
    %42 = arith.addf %40, %41 : vector<8x128xf32>
    %c0_17 = arith.constant 0 : index
    %c0_18 = arith.constant 0 : index
    %43 = vector.load %arg6[%c0_17, %c0_18] : memref<128x128xf32, #tpu.memory_space<vmem>>, vector<128x128xf32>
    %cst_19 = arith.constant dense<0.000000e+00> : vector<8x128xf32>
    %44 = tpu.matmul %42, %43, %cst_19 {dimension_numbers = #tpu.dot_dimension_numbers<[1], [0], [0], [1], [0, 0, 1, 1], [], []>} : vector<8x128xf32>, vector<128x128xf32>, vector<8x128xf32> -> vector<8x128xf32>
    %c0_20 = arith.constant 0 : index
    %c0_21 = arith.constant 0 : index
    %45 = vector.load %arg7[%c0_20, %c0_21] : memref<1x128xf32, #tpu.memory_space<vmem>>, vector<1x128xf32>
    %46 = vector.broadcast %45 : vector<1x128xf32> to vector<8x128xf32>
    %47 = arith.addf %44, %46 : vector<8x128xf32>
    %cst_22 = arith.constant 0.000000e+00 : f32
    %48 = vector.broadcast %cst_22 : f32 to vector<8x128xf32>
    %49 = arith.cmpf oge, %47, %48 : vector<8x128xf32>
    %cst_23 = arith.constant 0.00999999977 : f32
    %50 = vector.broadcast %cst_23 : f32 to vector<8x128xf32>
    %51 = arith.mulf %50, %47 : vector<8x128xf32>
    %52 = arith.select %49, %47, %51 : vector<8x128xi1>, vector<8x128xf32>
    %c0_24 = arith.constant 0 : index
    %c0_25 = arith.constant 0 : index
    %53 = vector.load %arg8[%c0_24, %c0_25] : memref<1x128xf32, #tpu.memory_space<vmem>>, vector<1x128xf32>
    %c0_26 = arith.constant 0 : index
    %c0_27 = arith.constant 0 : index
    %54 = vector.load %arg9[%c0_26, %c0_27] : memref<1x128xf32, #tpu.memory_space<vmem>>, vector<1x128xf32>
    %cst_28 = arith.constant dense<0.000000e+00> : vector<8xf32>
    %55 = vector.multi_reduction <add>, %52, %cst_28 [1] : vector<8x128xf32> to vector<8xf32>
    %56 = vector.shape_cast %55 : vector<8xf32> to vector<8x1xf32>
    %cst_29 = arith.constant 0.00999999977 : f32
    %57 = vector.broadcast %cst_29 : f32 to vector<8x1xf32>
    %58 = arith.mulf %56, %57 : vector<8x1xf32>
    %59 = vector.broadcast %58 : vector<8x1xf32> to vector<8x128xf32>
    %60 = arith.subf %52, %59 : vector<8x128xf32>
    %cst_30 = arith.constant 0.000000e+00 : f32
    %61 = vector.shape_cast %3 : vector<1x128xi1> to vector<1x128xi1>
    %62 = vector.broadcast %61 : vector<1x128xi1> to vector<8x128xi1>
    %63 = vector.broadcast %cst_30 : f32 to vector<8x128xf32>
    %64 = arith.select %62, %60, %63 : vector<8x128xi1>, vector<8x128xf32>
    %65 = arith.mulf %64, %64 : vector<8x128xf32>
    %cst_31 = arith.constant dense<0.000000e+00> : vector<8xf32>
    %66 = vector.multi_reduction <add>, %65, %cst_31 [1] : vector<8x128xf32> to vector<8xf32>
    %67 = vector.shape_cast %66 : vector<8xf32> to vector<8x1xf32>
    %cst_32 = arith.constant 0.00999999977 : f32
    %68 = vector.broadcast %cst_32 : f32 to vector<8x1xf32>
    %69 = arith.mulf %67, %68 : vector<8x1xf32>
    %cst_33 = arith.constant 9.99999974E-6 : f32
    %70 = vector.broadcast %cst_33 : f32 to vector<8x1xf32>
    %71 = arith.addf %69, %70 : vector<8x1xf32>
    %72 = math.rsqrt %71 : vector<8x1xf32>
    %73 = vector.broadcast %72 : vector<8x1xf32> to vector<8x128xf32>
    %74 = arith.mulf %64, %73 : vector<8x128xf32>
    %75 = vector.broadcast %53 : vector<1x128xf32> to vector<8x128xf32>
    %76 = arith.mulf %74, %75 : vector<8x128xf32>
    %77 = vector.broadcast %54 : vector<1x128xf32> to vector<8x128xf32>
    %78 = arith.addf %76, %77 : vector<8x128xf32>
    %c0_34 = arith.constant 0 : index
    %c0_35 = arith.constant 0 : index
    %79 = vector.load %arg10[%c0_34, %c0_35] : memref<128x128xf32, #tpu.memory_space<vmem>>, vector<128x128xf32>
    %cst_36 = arith.constant dense<0.000000e+00> : vector<8x128xf32>
    %80 = tpu.matmul %78, %79, %cst_36 {dimension_numbers = #tpu.dot_dimension_numbers<[1], [0], [0], [1], [0, 0, 1, 1], [], []>} : vector<8x128xf32>, vector<128x128xf32>, vector<8x128xf32> -> vector<8x128xf32>
    %c0_37 = arith.constant 0 : index
    %c0_38 = arith.constant 0 : index
    %81 = vector.load %arg11[%c0_37, %c0_38] : memref<1x128xf32, #tpu.memory_space<vmem>>, vector<1x128xf32>
    %82 = vector.broadcast %81 : vector<1x128xf32> to vector<8x128xf32>
    %83 = arith.addf %80, %82 : vector<8x128xf32>
    %cst_39 = arith.constant 0xFF800000 : f32
    %84 = vector.shape_cast %6 : vector<1x128xi1> to vector<1x128xi1>
    %85 = vector.broadcast %84 : vector<1x128xi1> to vector<8x128xi1>
    %86 = vector.broadcast %cst_39 : f32 to vector<8x128xf32>
    %87 = arith.select %85, %83, %86 : vector<8x128xi1>, vector<8x128xf32>
    %cst_40 = arith.constant dense<0xFF800000> : vector<8xf32>
    %88 = vector.multi_reduction <maximumf>, %87, %cst_40 [1] : vector<8x128xf32> to vector<8xf32>
    %89 = vector.shape_cast %88 : vector<8xf32> to vector<8x1xf32>
    %90 = vector.broadcast %89 : vector<8x1xf32> to vector<8x128xf32>
    %91 = arith.subf %87, %90 : vector<8x128xf32>
    %92 = math.exp %91 : vector<8x128xf32>
    %cst_41 = arith.constant 0.000000e+00 : f32
    %93 = vector.shape_cast %6 : vector<1x128xi1> to vector<1x128xi1>
    %94 = vector.broadcast %93 : vector<1x128xi1> to vector<8x128xi1>
    %95 = vector.broadcast %cst_41 : f32 to vector<8x128xf32>
    %96 = arith.select %94, %92, %95 : vector<8x128xi1>, vector<8x128xf32>
    %cst_42 = arith.constant dense<0.000000e+00> : vector<8xf32>
    %97 = vector.multi_reduction <add>, %96, %cst_42 [1] : vector<8x128xf32> to vector<8xf32>
    %98 = vector.shape_cast %97 : vector<8xf32> to vector<8x1xf32>
    %99 = math.log %98 : vector<8x1xf32>
    %100 = arith.addf %89, %99 : vector<8x1xf32>
    %c0_43 = arith.constant 0 : index
    %c0_44 = arith.constant 0 : index
    %101 = vector.load %arg12[%c0_43, %c0_44] : memref<8x128xf32, #tpu.memory_space<vmem>>, vector<8x128xf32>
    tpu.vector_store %arg12[%c0_43, %c0_44], %83 {strides = array<i32>} : memref<8x128xf32, #tpu.memory_space<vmem>>, vector<8x128xf32>,
    %102 = vector.broadcast %100 : vector<8x1xf32> to vector<8x128xf32>
    %103 = arith.subf %83, %102 : vector<8x128xf32>
    %c0_45 = arith.constant 0 : index
    %c0_46 = arith.constant 0 : index
    %104 = vector.load %arg13[%c0_45, %c0_46] : memref<8x128xf32, #tpu.memory_space<vmem>>, vector<8x128xf32>
    tpu.vector_store %arg13[%c0_45, %c0_46], %103 {strides = array<i32>} : memref<8x128xf32, #tpu.memory_space<vmem>>, vector<8x128xf32>,
    return
  }
  func.func @transform_0(%arg0: i32) -> (i32, i32) {
    %c0_i32 = arith.constant 0 : i32
    %c0_i32_0 = arith.constant 0 : i32
    return %arg0, %c0_i32 : i32, i32
  }
  func.func @transform_1(%arg0: i32) -> (i32, i32) {
    %c0_i32 = arith.constant 0 : i32
    %c0_i32_0 = arith.constant 0 : i32
    %c0_i32_1 = arith.constant 0 : i32
    return %c0_i32, %c0_i32_0 : i32, i32
  }
  func.func @transform_2(%arg0: i32) -> (i32, i32) {
    %c0_i32 = arith.constant 0 : i32
    %c0_i32_0 = arith.constant 0 : i32
    %c0_i32_1 = arith.constant 0 : i32
    return %c0_i32, %c0_i32_0 : i32, i32
  }
  func.func @transform_3(%arg0: i32) -> (i32, i32) {
    %c0_i32 = arith.constant 0 : i32
    %c0_i32_0 = arith.constant 0 : i32
    %c0_i32_1 = arith.constant 0 : i32
    return %c0_i32, %c0_i32_0 : i32, i32
  }
  func.func @transform_4(%arg0: i32) -> (i32, i32) {
    %c0_i32 = arith.constant 0 : i32
    %c0_i32_0 = arith.constant 0 : i32
    %c0_i32_1 = arith.constant 0 : i32
    return %c0_i32, %c0_i32_0 : i32, i32
  }
  func.func @transform_5(%arg0: i32) -> (i32, i32) {
    %c0_i32 = arith.constant 0 : i32
    %c0_i32_0 = arith.constant 0 : i32
    %c0_i32_1 = arith.constant 0 : i32
    return %c0_i32, %c0_i32_0 : i32, i32
  }
  func.func @transform_6(%arg0: i32) -> (i32, i32) {
    %c0_i32 = arith.constant 0 : i32
    %c0_i32_0 = arith.constant 0 : i32
    %c0_i32_1 = arith.constant 0 : i32
    return %c0_i32, %c0_i32_0 : i32, i32
  }
  func.func @transform_7(%arg0: i32) -> (i32, i32) {
    %c0_i32 = arith.constant 0 : i32
    %c0_i32_0 = arith.constant 0 : i32
    %c0_i32_1 = arith.constant 0 : i32
    return %c0_i32, %c0_i32_0 : i32, i32
  }
  func.func @transform_8(%arg0: i32) -> (i32, i32) {
    %c0_i32 = arith.constant 0 : i32
    %c0_i32_0 = arith.constant 0 : i32
    %c0_i32_1 = arith.constant 0 : i32
    return %c0_i32, %c0_i32_0 : i32, i32
  }
  func.func @transform_9(%arg0: i32) -> (i32, i32) {
    %c0_i32 = arith.constant 0 : i32
    %c0_i32_0 = arith.constant 0 : i32
    %c0_i32_1 = arith.constant 0 : i32
    return %c0_i32, %c0_i32_0 : i32, i32
  }
  func.func @transform_10(%arg0: i32) -> (i32, i32) {
    %c0_i32 = arith.constant 0 : i32
    %c0_i32_0 = arith.constant 0 : i32
    %c0_i32_1 = arith.constant 0 : i32
    return %c0_i32, %c0_i32_0 : i32, i32
  }
  func.func @transform_11(%arg0: i32) -> (i32, i32) {
    %c0_i32 = arith.constant 0 : i32
    %c0_i32_0 = arith.constant 0 : i32
    return %arg0, %c0_i32 : i32, i32
  }
  func.func @transform_12(%arg0: i32) -> (i32, i32) {
    %c0_i32 = arith.constant 0 : i32
    %c0_i32_0 = arith.constant 0 : i32
    return %arg0, %c0_i32 : i32, i32
  }
}

</mosaic_0001>

<bundles_post_ra>
// kernel: tpu_custom_call.1
= control target key start
LH: loop header
LB: loop body
LE: loop exit
PB: predicated region body
PF: predicated region fallthrough
CT: control target
= control target key end

     0   :  { %18 = vsyncpa [#allocation3], 0  ;;  %s1100_s0 = inlined_call_operand.hbm [shape: f32[8,128], index: 0, kind: input, shape index: {}]   ;;  %s1101_s1 = inlined_call_operand.hbm [shape: f32[128,128], index: 1, kind: input, shape index: {}]   ;;  %s1102_s2 = inlined_call_operand.vmem [shape: f32[1,128], index: 2, kind: input, shape index: {}]   ;;  %s1103_s3 = inlined_call_operand.vmem [shape: f32[1,128], index: 3, kind: input, shape index: {}]   ;;  %s1104_s4 = inlined_call_operand.vmem [shape: f32[1,128], index: 4, kind: input, shape index: {}]   ;;  %s1105_s5 = inlined_call_operand.hbm [shape: f32[128,128], index: 5, kind: input, shape index: {}]   ;;  %s1106_s6 = inlined_call_operand.vmem [shape: f32[1,128], index: 6, kind: input, shape index: {}]   ;;  %s1107_s7 = inlined_call_operand.vmem [shape: f32[1,128], index: 7, kind: input, shape index: {}]   ;;  %s1108_s8 = inlined_call_operand.vmem [shape: f32[1,128], index: 8, kind: input, shape index: {}]   ;;  %s1109_s9 = inlined_call_operand.hbm [shape: f32[128,128], index: 9, kind: input, shape index: {}]   ;;  %s1110_s10 = inlined_call_operand.vmem [shape: f32[1,128], index: 10, kind: input, shape index: {}]   ;;  %s1111_s11 = inlined_call_operand.hbm [shape: f32[8,128], index: 11, kind: output, shape index: {0}]   ;;  %s1112_s12 = inlined_call_operand.hbm [shape: f32[8,128], index: 12, kind: output, shape index: {1}]  }
   0x1   :  { %19 = vsyncpa [#allocation6], 0 }
   0x2   :  { %20 = vsyncpa [#allocation9], 0 }
   0x3   :  { %21 = vsyncpa [#allocation4], 0 }
   0x4   :  { %22 = vsyncpa [#allocation12], 0  ;;  %s887_s21 = smov [#allocation5]   ;;  %s745_s25 = scalar_lea.hbm %s1101_s1, 2048 }
   0x5   :  { %s38_s22 = sshll.u32 %s887_s21, 4  ;;  %p746_p0 = scmp.ne.s32.totalorder %s1101_s1, %s745_s25  ;;  %s39_s22 = int_to_ptr.vmem [resolvable:$true] %s38_s22 }
   0x6   :  { %p749_p1 = scmp.lt.u32.totalorder %s745_s25, %s1101_s1 }
   0x8   :  { %p751_p2 = pnand %p749_p1, %p746_p0 }
   0xa   :  { %754 = shalt.err (!%p751_p2)
}
   0xb   :  { %s755_s30 = scalar_lea.vmem %s39_s22, 2048  ;;  %p760_p4 = scmp.lt.s32.totalorder %s39_s22, %s39_s22 }
   0xc   :  { %p756_p3 = scmp.ne.s32.totalorder %s39_s22, %s755_s30  ;;  %p761_p5 = scmp.lt.s32.totalorder %s755_s30, %s755_s30 }
   0xe   :  { %p762_p6 = por %p761_p5, %p760_p4 }
  0x10   :  { %p763_p7 = pnand %p762_p6, %p756_p3 }
  0x12   :  { %766 = shalt.err (!%p763_p7)
}
  0x13   :  { %s888_s13 = smov 128   ;;  %s889_s14 = smov 8  }
  0x14   :  { %44 = dma.hbm_to_vmem [thread:$0]  %s1101_s1, 2048, %s39_s22, [#allocation6], %s888_s13, %s888_s13, %s889_s14  }
  0x15   :  { %s890_s17 = smov [#allocation2]   ;;  %s891_s19 = smov [#allocation7]  }
  0x16   :  { %s29_s18 = sshll.u32 %s890_s17, 4  ;;  %s56_s20 = sshll.u32 %s891_s19, 4  ;;  %s30_s18 = int_to_ptr.vmem [resolvable:$true] %s29_s18  ;;  %s57_s20 = int_to_ptr.vmem [resolvable:$true] %s56_s20 }
  0x17   :  { %s767_s24 = scalar_lea.hbm %s1100_s0, 128 }
  0x18   :  { %p768_p8 = scmp.ne.s32.totalorder %s1100_s0, %s767_s24  ;;  %p771_p9 = scmp.lt.u32.totalorder %s767_s24, %s1100_s0 }
  0x1a   :  { %p773_p10 = pnand %p771_p9, %p768_p8 }
  0x1c   :  { %776 = shalt.err (!%p773_p10)
}
  0x1d   :  { %s777_s1 = scalar_lea.vmem %s30_s18, 128  ;;  %p782_p12 = scmp.lt.s32.totalorder %s30_s18, %s30_s18 }
  0x1e   :  { %p778_p11 = scmp.ne.s32.totalorder %s30_s18, %s777_s1  ;;  %p783_p13 = scmp.lt.s32.totalorder %s777_s1, %s777_s1 }
  0x20   :  { %p784_p0 = por %p783_p13, %p782_p12 }
  0x22   :  { %p785_p1 = pnand %p784_p0, %p778_p11 }
  0x24   :  { %788 = shalt.err (!%p785_p1)
}
  0x25   :  { %32 = dma.hbm_to_vmem [thread:$0]  %s1100_s0, 128, %s30_s18, [#allocation3]  }
  0x26   :  { %s789_s16 = scalar_lea.hbm %s1105_s5, 2048 }
  0x27   :  { %p790_p2 = scmp.ne.s32.totalorder %s1105_s5, %s789_s16  ;;  %p793_p3 = scmp.lt.u32.totalorder %s789_s16, %s1105_s5 }
  0x29   :  { %p795_p4 = pnand %p793_p3, %p790_p2 }
  0x2b   :  { %798 = shalt.err (!%p795_p4)
}
  0x2c   :  { %s799_s24 = scalar_lea.vmem %s57_s20, 2048  ;;  %p804_p6 = scmp.lt.s32.totalorder %s57_s20, %s57_s20 }
  0x2d   :  { %p800_p5 = scmp.ne.s32.totalorder %s57_s20, %s799_s24  ;;  %p805_p7 = scmp.lt.s32.totalorder %s799_s24, %s799_s24 }
  0x2f   :  { %p806_p8 = por %p805_p7, %p804_p6 }
  0x31   :  { %p807_p9 = pnand %p806_p8, %p800_p5 }
  0x33   :  { %810 = shalt.err (!%p807_p9)
}
  0x34   :  { %62 = dma.hbm_to_vmem [thread:$0]  %s1105_s5, 2048, %s57_s20, [#allocation6], %s888_s13, %s888_s13, %s889_s14  }
  0x35   :  { %s892_s25 = smov [#allocation8]   ;;  %s811_s1 = scalar_lea.hbm %s1109_s9, 2048 }
  0x36   :  { %s74_s26 = sshll.u32 %s892_s25, 4  ;;  %p812_p10 = scmp.ne.s32.totalorder %s1109_s9, %s811_s1  ;;  %s75_s26 = int_to_ptr.vmem [resolvable:$true] %s74_s26 }
  0x37   :  { %p815_p11 = scmp.lt.u32.totalorder %s811_s1, %s1109_s9 }
  0x39   :  { %p817_p12 = pnand %p815_p11, %p812_p10 }
  0x3b   :  { %820 = shalt.err (!%p817_p12)
}
  0x3c   :  { %s821_s16 = scalar_lea.vmem %s75_s26, 2048  ;;  %p826_p0 = scmp.lt.s32.totalorder %s75_s26, %s75_s26 }
  0x3d   :  { %p822_p13 = scmp.ne.s32.totalorder %s75_s26, %s821_s16  ;;  %p827_p1 = scmp.lt.s32.totalorder %s821_s16, %s821_s16 }
  0x3f   :  { %p828_p2 = por %p827_p1, %p826_p0 }
  0x41   :  { %p829_p3 = pnand %p828_p2, %p822_p13 }
  0x43   :  { %832 = shalt.err (!%p829_p3)
}
  0x44   :  { %80 = dma.hbm_to_vmem [thread:$0]  %s1109_s9, 2048, %s75_s26, [#allocation9], %s888_s13, %s888_s13, %s889_s14  }
  0x45   :  { %877 = dma.done.wait [#allocation3], 128  }
  0x46   :  { %878 = vsyncadd [#allocation3], 4294967168 }
  0x47   :  { %879 = dma.done.wait [#allocation6], 4096  }
  0x48   :  { %880 = vsyncadd [#allocation6], 4294963200 }
  0x49   :  { %881 = dma.done.wait [#allocation9], 2048  }
  0x4a   :  { %882 = vsyncadd [#allocation9], 4294965248  ;;  %v893_v0 = vmov 0.0|0.0   ;;  %vm894_vm0 = vmmov 0   ;;  %v895_v1 = vmov 0.0   ;;  %v100_v2 = vld [vmem:[#allocation5] sm:$0xff]  ;;  %v96_v42 = vlaneseq }
  0x4b   :  { %654 = vmatprep.subr.bf16.mxu0 %v893_v0  ;;  %581 = vmatprep.mubr.msk.f32.mxu0 %vm894_vm0, %v895_v1  ;;  %v101_v3 = vld [vmem:[#allocation5 + $0x8] sm:$0xff]  ;;  %v102_v4 = vld [vmem:[#allocation5 + $0x10] sm:$0xff]  ;;  %v103_v6 = vld [vmem:[#allocation5 + $0x18] sm:$0xff] }
  0x4c   :  { %678 = vmatprep.subr.bf16.mxu1 %v893_v0  ;;  %616 = vmatprep.mubr.msk.f32.mxu1 %vm894_vm0, %v895_v1  ;;  %v655_v5 = vpack.c.bf16 %v101_v3, %v100_v2  ;;  %v658_v7 = vpack.c.bf16 %v103_v6, %v102_v4  ;;  %v104_v8 = vld [vmem:[#allocation5 + $0x20] sm:$0xff]  ;;  %v105_v9 = vld [vmem:[#allocation5 + $0x28] sm:$0xff]  ;;  %v106_v11 = vld [vmem:[#allocation5 + $0x30] sm:$0xff]  ;;  %v1039_v43 = vand.u32 127, %v96_v42 }
  0x4d   :  { %v661_v10 = vpack.c.bf16 %v105_v9, %v104_v8  ;;  %v107_v12 = vld [vmem:[#allocation5 + $0x38] sm:$0xff]  ;;  %v108_v14 = vld [vmem:[#allocation5 + $0x40] sm:$0xff]  ;;  %v109_v15 = vld [vmem:[#allocation5 + $0x48] sm:$0xff] }
  0x4e   :  { %656 = vmatpush3.bf16.msra.mxu0 %v655_v5  ;;  %v664_v13 = vpack.c.bf16 %v107_v12, %v106_v11  ;;  %v667_v16 = vpack.c.bf16 %v109_v15, %v108_v14  ;;  %v110_v17 = vld [vmem:[#allocation5 + $0x50] sm:$0xff]  ;;  %v111_v18 = vld [vmem:[#allocation5 + $0x58] sm:$0xff]  ;;  %v112_v20 = vld [vmem:[#allocation5 + $0x60] sm:$0xff]  ;;  %vm98_vm2 = vcmp.lt.s32.totalorder %v1039_v43, 100  ;;  %vm99_vm4 = vcmp.lt.s32.totalorder %v1039_v43, 8 }
  0x4f   :  { %657 = vmatprep.subr.bf16.mxu0 %v893_v0  ;;  %v670_v19 = vpack.c.bf16 %v111_v18, %v110_v17  ;;  %v113_v21 = vld [vmem:[#allocation5 + $0x68] sm:$0xff]  ;;  %v114_v23 = vld [vmem:[#allocation5 + $0x70] sm:$0xff]  ;;  %v115_v24 = vld [vmem:[#allocation5 + $0x78] sm:$0xff] }
  0x50   :  { %v673_v22 = vpack.c.bf16 %v113_v21, %v112_v20  ;;  %v676_v25 = vpack.c.bf16 %v115_v24, %v114_v23  ;;  %v95_v26 = vld [vmem:[#allocation2] sm:$0xff]  ;;  %v226_v33 = vld [vmem:[#allocation7] sm:$0xff]  ;;  %v227_v34 = vld [vmem:[#allocation7 + $0x8] sm:$0xff] }
  0x51   :  { %v491_v27 = vld [vmem:[%s1102_s2] ss:$0 sm:$0xff]  ;;  %v228_v35 = vld [vmem:[#allocation7 + $0x10] sm:$0xff]  ;;  %v679_v36 = vpack.c.bf16 %v227_v34, %v226_v33  ;;  %v230_v39 = vld [vmem:[#allocation7 + $0x20] sm:$0xff] }
  0x52   :  { %659 = vmatpush3.bf16.msra.mxu0 %v658_v7  ;;  %v229_v37 = vld [vmem:[#allocation7 + $0x18] sm:$0xff]  ;;  %v231_v40 = vld [vmem:[#allocation7 + $0x28] sm:$0xff]  ;;  %v232_v49 = vld [vmem:[#allocation7 + $0x30] sm:$0xff] }
  0x53   :  { %660 = vmatprep.subr.bf16.mxu0 %v893_v0  ;;  %680 = vmatpush3.bf16.msra.mxu1 %v679_v36  ;;  %v682_v38 = vpack.c.bf16 %v229_v37, %v228_v35  ;;  %v685_v41 = vpack.c.bf16 %v231_v40, %v230_v39  ;;  %v233_v50 = vld [vmem:[#allocation7 + $0x38] sm:$0xff]  ;;  %v234_v52 = vld [vmem:[#allocation7 + $0x40] sm:$0xff]  ;;  %v235_v53 = vld [vmem:[#allocation7 + $0x48] sm:$0xff] }
  0x54   :  { %681 = vmatprep.subr.bf16.mxu1 %v893_v0  ;;  %v688_v51 = vpack.c.bf16 %v233_v50, %v232_v49  ;;  %v691_v54 = vpack.c.bf16 %v235_v53, %v234_v52  ;;  %v236_v55 = vld [vmem:[#allocation7 + $0x50] sm:$0xff]  ;;  %v237_v56 = vld [vmem:[#allocation7 + $0x58] sm:$0xff]  ;;  %v238_v58 = vld [vmem:[#allocation7 + $0x60] sm:$0xff] }
  0x55   :  { %v694_v57 = vpack.c.bf16 %v237_v56, %v236_v55  ;;  %v239_v59 = vld [vmem:[#allocation7 + $0x68] sm:$0xff]  ;;  %v240_v61 = vld [vmem:[#allocation7 + $0x70] sm:$0xff]  ;;  %v241_v62 = vld [vmem:[#allocation7 + $0x78] sm:$0xff] }
  0x56   :  { %662 = vmatpush3.bf16.msra.mxu0 %v661_v10  ;;  %v697_v60 = vpack.c.bf16 %v239_v59, %v238_v58  ;;  %v700_v63 = vpack.c.bf16 %v241_v62, %v240_v61  ;;  %v492_v5 = vld [vmem:[%s1103_s3] ss:$0 sm:$0xff]  ;;  %v351_v17 = vld [vmem:[#allocation8 + $0x8] sm:$0xff]  ;;  %v352_v18 = vld [vmem:[#allocation8 + $0x10] sm:$0xff] }
  0x57   :  { %663 = vmatprep.subr.bf16.mxu0 %v893_v0  ;;  %683 = vmatpush3.bf16.msra.mxu1 %v682_v38  ;;  %v493_v7 = vld [vmem:[%s1104_s4] ss:$0 sm:$0xff]  ;;  %v355_v23 = vld [vmem:[#allocation8 + $0x28] sm:$0xff]  ;;  %v358_v33 = vld [vmem:[#allocation8 + $0x40] sm:$0xff] }
  0x58   :  { %684 = vmatprep.subr.bf16.mxu1 %v893_v0  ;;  %v494_v10 = vld [vmem:[%s1106_s6] ss:$0 sm:$0xff]  ;;  %v359_v34 = vld [vmem:[#allocation8 + $0x48] sm:$0xff]  ;;  %v360_v36 = vld [vmem:[#allocation8 + $0x50] sm:$0xff] }
  0x59   :  { %v353_v20 = vld [vmem:[#allocation8 + $0x18] sm:$0xff]  ;;  %v715_v35 = vpack.c.bf16 %v359_v34, %v358_v33  ;;  %v362_v39 = vld [vmem:[#allocation8 + $0x60] sm:$0xff]  ;;  %v363_v40 = vld [vmem:[#allocation8 + $0x68] sm:$0xff] }
  0x5a   :  { %665 = vmatpush3.bf16.msra.mxu0 %v664_v13  ;;  %v706_v21 = vpack.c.bf16 %v353_v20, %v352_v18  ;;  %v361_v37 = vld [vmem:[#allocation8 + $0x58] sm:$0xff]  ;;  %v364_v42 = vld [vmem:[#allocation8 + $0x70] sm:$0xff] }
  0x5b   :  { %666 = vmatprep.subr.bf16.mxu0 %v893_v0  ;;  %686 = vmatpush3.bf16.msra.mxu1 %v685_v41  ;;  %v718_v38 = vpack.c.bf16 %v361_v37, %v360_v36  ;;  %v721_v41 = vpack.c.bf16 %v363_v40, %v362_v39  ;;  %v495_v50 = vld [vmem:[%s1107_s7] ss:$0 sm:$0xff]  ;;  %s896_s7 = smov [#allocation10]  }
  0x5c   :  { %687 = vmatprep.subr.bf16.mxu1 %v893_v0  ;;  %v496_v52 = vld [vmem:[%s1108_s8] ss:$0 sm:$0xff]  ;;  %s466_s8 = sshll.u32 %s896_s7, 4  ;;  %s467_s8 = int_to_ptr.vmem [resolvable:$true] %s466_s8 }
  0x5d   :  { %s833_s25 = scalar_lea.vmem %s467_s8, 128  ;;  %p838_p5 = scmp.lt.s32.totalorder %s467_s8, %s467_s8 }
  0x5e   :  { %668 = vmatpush3.bf16.msra.mxu0 %v667_v16  ;;  %v350_v16 = vld [vmem:[#allocation8] sm:$0xff]  ;;  %p834_p4 = scmp.ne.s32.totalorder %s467_s8, %s833_s25  ;;  %p839_p6 = scmp.lt.s32.totalorder %s833_s25, %s833_s25 }
  0x5f   :  { %669 = vmatprep.subr.bf16.mxu0 %v893_v0  ;;  %689 = vmatpush3.bf16.msra.mxu1 %v688_v51 }
  0x60   :  { %690 = vmatprep.subr.bf16.mxu1 %v893_v0  ;;  %p840_p7 = por %p839_p6, %p838_p5 }
  0x62   :  { %671 = vmatpush3.bf16.msra.mxu0 %v670_v19  ;;  %v703_v19 = vpack.c.bf16 %v351_v17, %v350_v16  ;;  %p841_p8 = pnand %p840_p7, %p834_p4 }
  0x63   :  { %672 = vmatprep.subr.bf16.mxu0 %v893_v0  ;;  %692 = vmatpush3.bf16.msra.mxu1 %v691_v54 }
  0x64   :  { %693 = vmatprep.subr.bf16.mxu1 %v893_v0 }
  0x66   :  { %674 = vmatpush3.bf16.msra.mxu0 %v673_v22  ;;  %v354_v22 = vld [vmem:[#allocation8 + $0x20] sm:$0xff] }
  0x67   :  { %675 = vmatprep.subr.bf16.mxu0 %v893_v0  ;;  %695 = vmatpush3.bf16.msra.mxu1 %v694_v57  ;;  %v709_v24 = vpack.c.bf16 %v355_v23, %v354_v22 }
  0x68   :  { %696 = vmatprep.subr.bf16.mxu1 %v893_v0 }
  0x6a   :  { %677 = vmatpush3.bf16.msra.mxu0 %v676_v25 }
  0x6b   :  { %702 = vmatprep.subr.bf16.mxu0 %v893_v0  ;;  %698 = vmatpush3.bf16.msra.mxu1 %v697_v60 }
  0x6c   :  { %699 = vmatprep.subr.bf16.mxu1 %v893_v0 }
  0x6d   :  { %582 = vmatmul.mubr.f32.vlgmr.msra.gmra.mrb[0].mxu0 %v95_v26 }
  0x6e   :  { %651 = vmatprep.mubr.msk.f32.mxu0 %vm894_vm0, %v895_v1  ;;  %704 = vmatpush3.bf16.msra.mxu0 %v703_v19 }
  0x6f   :  { %701 = vmatpush3.bf16.msra.mxu1 %v700_v63  ;;  %705 = vmatprep.subr.bf16.mxu0 %v893_v0 }
  0x72   :  { %707 = vmatpush3.bf16.msra.mxu0 %v706_v21 }
  0x73   :  { %708 = vmatprep.subr.bf16.mxu0 %v893_v0 }
  0x76   :  { %710 = vmatpush3.bf16.msra.mxu0 %v709_v24 }
  0x77   :  { %711 = vmatprep.subr.bf16.mxu0 %v893_v0 }
 0x140   :  { %v189_v28 = vpop.f32.mrb[0].mxu0 }
 0x141   :  { %v190_v29 = vadd.f32 %v491_v27, %v189_v28  ;;  %v583_v30 = vpop.f32.mrb[1].mxu0 }
 0x142   :  { %v356_v30 = vld [vmem:[#allocation8 + $0x30] sm:$0xff] }
 0x143   :  { %vm193_vm1 = vcmp.ge.f32.partialorder %v190_v29, 0.0  ;;  %v194_v31 = vmul.f32 0.01, %v190_v29 }
 0x145   :  { %v195_v32 = vsel %vm193_vm1, %v190_v29, %v194_v31  ;;  %v357_v31 = vld [vmem:[#allocation8 + $0x38] sm:$0xff] }
 0x146   :  { %198 = vadd.xlane.f32.xlu0 %v195_v32 }
 0x1d3   :  { %v199_v44 = vpop.xlane.xlu0 %198 }
 0x1d4   :  { %v200_v45 = vmul.f32 0.01, %v199_v44  ;;  %v365_v44 = vld [vmem:[#allocation8 + $0x78] sm:$0xff] }
 0x1d6   :  { %v201_v46 = vsub.f32 %v195_v32, %v200_v45  ;;  %v712_v32 = vpack.c.bf16 %v357_v31, %v356_v30  ;;  %v724_v45 = vpack.c.bf16 %v365_v44, %v364_v42 }
 0x1d8   :  { %v204_v47 = vsel %vm98_vm2, %v201_v46, 0.0  ;;  %713 = vmatpush3.bf16.msra.mxu0 %v712_v32 }
 0x1d9   :  { %v205_v48 = vmul.f32 %v204_v47, %v204_v47  ;;  %714 = vmatprep.subr.bf16.mxu0 %v893_v0 }
 0x1db   :  { %206 = vadd.xlane.f32.xlu0 %v205_v48 }
 0x1dc   :  { %716 = vmatpush3.bf16.msra.mxu0 %v715_v35 }
 0x1dd   :  { %717 = vmatprep.subr.bf16.mxu0 %v893_v0 }
 0x1e0   :  { %719 = vmatpush3.bf16.msra.mxu0 %v718_v38 }
 0x1e1   :  { %720 = vmatprep.subr.bf16.mxu0 %v893_v0 }
 0x1e4   :  { %722 = vmatpush3.bf16.msra.mxu0 %v721_v41 }
 0x1e5   :  { %723 = vmatprep.subr.bf16.mxu0 %v893_v0  ;;  %v497_v0 = vld [vmem:[%s1110_s10] ss:$0 sm:$0xff] }
 0x1e8   :  { %725 = vmatpush3.bf16.msra.mxu0 %v724_v45 }
 0x268   :  { %v207_v1 = vpop.xlane.xlu0 %206 }
 0x269   :  { %v208_v2 = vmul.f32 0.01, %v207_v1 }
 0x26b   :  { %v209_v3 = vadd.f32 1e-05, %v208_v2 }
 0x26d   :  { %737 = vrsqrt.f32 %v209_v3 }
 0x277   :  { %v738_v4 = vpop.eup %737 }
 0x278   :  { %v211_v6 = vmul.f32 %v738_v4, %v204_v47 }
 0x27a   :  { %v218_v8 = vmul.f32 %v492_v5, %v211_v6 }
 0x27c   :  { %v225_v9 = vadd.f32 %v493_v7, %v218_v8 }
 0x27e   :  { %617 = vmatmul.mubr.f32.vlgmr.msra.gmra.mrb[0].mxu1 %v225_v9 }
 0x351   :  { %v315_v11 = vpop.f32.mrb[0].mxu1 }
 0x352   :  { %v316_v12 = vadd.f32 %v494_v10, %v315_v11  ;;  %v618_v13 = vpop.f32.mrb[1].mxu1 }
 0x354   :  { %vm319_vm3 = vcmp.ge.f32.partialorder %v316_v12, 0.0  ;;  %v320_v14 = vmul.f32 0.01, %v316_v12 }
 0x356   :  { %v321_v15 = vsel %vm319_vm3, %v316_v12, %v320_v14 }
 0x357   :  { %324 = vadd.xlane.f32.xlu1 %v321_v15 }
 0x3e4   :  { %v325_v25 = vpop.xlane.xlu1 %324 }
 0x3e5   :  { %v326_v26 = vmul.f32 0.01, %v325_v25 }
 0x3e7   :  { %v327_v27 = vsub.f32 %v321_v15, %v326_v26 }
 0x3e9   :  { %v328_v28 = vsel %vm98_vm2, %v327_v27, 0.0 }
 0x3ea   :  { %v329_v29 = vmul.f32 %v328_v28, %v328_v28 }
 0x3ec   :  { %330 = vadd.xlane.f32.xlu1 %v329_v29 }
 0x479   :  { %v331_v46 = vpop.xlane.xlu1 %330 }
 0x47a   :  { %v332_v47 = vmul.f32 0.01, %v331_v46 }
 0x47c   :  { %v333_v48 = vadd.f32 1e-05, %v332_v47 }
 0x47e   :  { %739 = vrsqrt.f32 %v333_v48 }
 0x488   :  { %v740_v49 = vpop.eup %739 }
 0x489   :  { %v335_v51 = vmul.f32 %v740_v49, %v328_v28 }
 0x48b   :  { %v342_v53 = vmul.f32 %v495_v50, %v335_v51 }
 0x48d   :  { %v349_v54 = vadd.f32 %v496_v52, %v342_v53 }
 0x48f   :  { %652 = vmatmul.mubr.f32.vlgmr.msra.gmra.mrb[2].mxu0 %v349_v54 }
 0x562   :  { %v439_v55 = vpop.f32.mrb[2].mxu0 }
 0x563   :  { %v440_v56 = vadd.f32 %v497_v0, %v439_v55  ;;  %v653_v57 = vpop.f32.mrb[3].mxu0 }
 0x565   :  { %457 = vst [vmem:[#allocation10] sm:$0xff] %v440_v56  ;;  %v445_v58 = vsel %vm99_vm4, %v440_v56, -inf }
 0x566   :  { %446 = vmax.xlane.f32.xlu0 %v445_v58 }
 0x5f3   :  { %v447_v59 = vpop.xlane.xlu0 %446 }
 0x5f4   :  { %v448_v60 = vsub.f32 %v445_v58, %v447_v59 }
 0x5f6   :  { %v449_v61 = vmul.f32 1.442695, %v448_v60 }
 0x5f8   :  { %741 = vpow2.f32 %v449_v61 }
 0x602   :  { %v742_v62 = vpop.eup %741 }
 0x603   :  { %v451_v63 = vsel %vm99_vm4, %v742_v62, 0.0 }
 0x604   :  { %452 = vadd.xlane.f32.xlu1 %v451_v63 }
 0x605   :  { %844 = shalt.err (!%p841_p8)
}
 0x606   :  { %s845_s27 = scalar_lea.hbm %s1111_s11, 128 }
 0x607   :  { %p846_p9 = scmp.ne.s32.totalorder %s1111_s11, %s845_s27  ;;  %p849_p10 = scmp.lt.u32.totalorder %s845_s27, %s1111_s11 }
 0x609   :  { %p851_p11 = pnand %p849_p10, %p846_p9 }
 0x60b   :  { %854 = shalt.err (!%p851_p11)
}
 0x60c   :  { %469 = dma.vmem_to_hbm [thread:$0]  %s467_s8, 128, %s1111_s11, [#allocation4]  }
 0x60d   :  { %s897_s16 = smov [#allocation11]  }
 0x60e   :  { %s476_s5 = sshll.u32 %s897_s16, 4  ;;  %s477_s5 = int_to_ptr.vmem [resolvable:$true] %s476_s5 }
 0x60f   :  { %s855_s20 = scalar_lea.vmem %s477_s5, 128  ;;  %p860_p13 = scmp.lt.s32.totalorder %s477_s5, %s477_s5 }
 0x610   :  { %p856_p12 = scmp.ne.s32.totalorder %s477_s5, %s855_s20  ;;  %p861_p0 = scmp.lt.s32.totalorder %s855_s20, %s855_s20 }
 0x612   :  { %p862_p1 = por %p861_p0, %p860_p13 }
 0x614   :  { %p863_p2 = pnand %p862_p1, %p856_p12 }
 0x691   :  { %v453_v43 = vpop.xlane.xlu1 %452 }
 0x692   :  { %743 = vlog2.f32 %v453_v43 }
 0x69c   :  { %v744_v1 = vpop.eup %743 }
 0x69d   :  { %v455_v2 = vmul.f32 0.6931472, %v744_v1 }
 0x69f   :  { %v456_v3 = vadd.f32 %v455_v2, %v447_v59 }
 0x6a1   :  { %v458_v4 = vsub.f32 %v440_v56, %v456_v3 }
 0x6a3   :  { %459 = vst [vmem:[#allocation11] sm:$0xff] %v458_v4 }
 0x6a4   :  { %866 = shalt.err (!%p863_p2)
}
 0x6a5   :  { %s867_s11 = scalar_lea.hbm %s1112_s12, 128 }
 0x6a6   :  { %p868_p3 = scmp.ne.s32.totalorder %s1112_s12, %s867_s11  ;;  %p871_p4 = scmp.lt.u32.totalorder %s867_s11, %s1112_s12 }
 0x6a8   :  { %p873_p5 = pnand %p871_p4, %p868_p3 }
 0x6aa   :  { %876 = shalt.err (!%p873_p5)
}
 0x6ab   :  { %479 = dma.vmem_to_hbm [thread:$0]  %s477_s5, 128, %s1112_s12, [#allocation12]  }
 0x6ac   :  { %883 = dma.done.wait [#allocation4], 128  }
 0x6ad   :  { %884 = vsyncadd [#allocation4], 4294967168 }
 0x6ae   :  { %885 = dma.done.wait [#allocation12], 128  }
 0x6af   :  { %886 = vsyncadd [#allocation12], 4294967168 }
 0x6b0   :  { %486 = vsyncpa [#allocation3], 1 }
 0x6b1   :  { %487 = vsyncpa [#allocation6], 1 }
 0x6b2   :  { %488 = vsyncpa [#allocation9], 1 }
 0x6b3   :  { %489 = vsyncpa [#allocation4], 1 }
 0x6b4   :  { %490 = vsyncpa [#allocation12], 1 }

</bundles_post_ra>
